<compile_context>
chip_gen: v5e
topology: v5e:2x2
jax: 0.10.0
libtpu: 0.0.40
codegen_flags: <defaults>
</compile_context>

<pallas_src>
import functools

import jax
import jax.numpy as jnp
from jax.experimental import pallas as pl
from jax.experimental.pallas import tpu as pltpu


def _nll_smooth_kernel(probs_ref, tgt_ref, out_ref, acc_ref, *,
                       confidence, smoothing, n_rows, block_rows):
    pid = pl.program_id(0)

    @pl.when(pid == 0)
    def _init():
        acc_ref[...] = jnp.zeros_like(acc_ref)

    x = probs_ref[...].astype(jnp.float32)                     # (TR, V)
    tr, v = x.shape

    # Numerically-stable log-sum-exp along the class (lane) axis.
    m = jnp.max(x, axis=-1, keepdims=True)                     # (TR, 1)
    shifted = x - m                                            # (TR, V)
    lse = jnp.log(jnp.sum(jnp.exp(shifted), axis=-1, keepdims=True))  # (TR, 1)

    # Gather shifted logit at the target class via select + row-sum
    # (no materialized logprobs, no float one-hot multiply).
    col = jax.lax.broadcasted_iota(jnp.int32, (tr, v), dimension=1)
    tgt_shifted = jnp.sum(
        jnp.where(col == tgt_ref[...], shifted, 0.0),
        axis=-1, keepdims=True)                                # (TR, 1)

    nll_loss = lse - tgt_shifted                               # -logprob[target]
    # -mean(logprobs, -1) == lse - sum(shifted)/V
    smooth_loss = lse - jnp.sum(shifted, axis=-1, keepdims=True) * (1.0 / v)

    row_loss = confidence * nll_loss + smoothing * smooth_loss  # (TR, 1)

    # Mask rows past the true batch size (padded rows of the last block).
    row_idx = pid * block_rows + jax.lax.broadcasted_iota(
        jnp.int32, (tr, 1), dimension=0)
    row_loss = jnp.where(row_idx < n_rows, row_loss, 0.0)

    acc_ref[...] += jnp.sum(row_loss, keepdims=True)           # (1, 1)

    @pl.when(pid == pl.num_programs(0) - 1)
    def _finalize():
        # Single 1/N scale at the end; the (1,1) output is written exactly once.
        out_ref[...] = acc_ref[...] * (1.0 / n_rows)


def _pick_block_rows(n, v, itemsize):
    """Row tile such that a double-buffered (TR, V) input stays well within
    the scoped-VMEM budget on every generation (incl. v7x's smaller VMEM)."""
    budget = 8 * 1024 * 1024                      # bytes per input buffer pair
    tr = budget // max(1, 2 * v * itemsize)
    tr = max(8, min(tr, 512))
    tr = (tr // 8) * 8                            # respect (8, 128) sublane tiling
    return min(tr, n) if n >= 8 else n


def nll_label_smoothing(probs, target, smoothing=0.0, block_rows=None):
    """probs: [N, V] float logits; target: [N] int class indices. Returns scalar."""
    n, v = probs.shape
    confidence = 1.0 - smoothing
    tgt2d = target.astype(jnp.int32).reshape(n, 1)

    if block_rows is None:
        block_rows = _pick_block_rows(n, v, probs.dtype.itemsize)
    block_rows = min(block_rows, n)
    grid = (pl.cdiv(n, block_rows),)

    kernel = functools.partial(
        _nll_smooth_kernel,
        confidence=confidence,
        smoothing=smoothing,
        n_rows=n,
        block_rows=block_rows,
    )

    out = pl.pallas_call(
        kernel,
        out_shape=jax.ShapeDtypeStruct((1, 1), jnp.float32),
        grid=grid,
        in_specs=[
            pl.BlockSpec((block_rows, v), lambda i: (i, 0)),
            pl.BlockSpec((block_rows, 1), lambda i: (i, 0)),
        ],
        out_specs=pl.BlockSpec((1, 1), lambda i: (0, 0)),
        scratch_shapes=[pltpu.VMEM((1, 1), jnp.float32)],
        compiler_params=pltpu.CompilerParams(
            dimension_semantics=("arbitrary",)),
    )(probs, tgt2d)
    return out[0, 0]


def _reference(probs, target, smoothing):
    logprobs = jax.nn.log_softmax(probs.astype(jnp.float32), axis=-1)
    nll = -jnp.take_along_axis(logprobs, target[:, None], axis=-1)[:, 0]
    smooth = -jnp.mean(logprobs, axis=-1)
    loss = (1.0 - smoothing) * nll + smoothing * smooth
    return jnp.mean(loss)


if __name__ == "__main__":
    key = jax.random.PRNGKey(0)
    k1, k2, k3, k4 = jax.random.split(key, 4)
    smoothing = 0.1

    # Case 1: N divisible by the row tile (grid of 4, pipelined accumulation).
    N, V = 256, 512
    probs = jax.random.normal(k1, (N, V), dtype=jnp.float32)
    target = jax.random.randint(k2, (N,), 0, V, dtype=jnp.int32)
    loss = jax.block_until_ready(
        nll_label_smoothing(probs, target, smoothing=smoothing, block_rows=64))
    ref = _reference(probs, target, smoothing)
    assert jnp.allclose(loss, ref, atol=1e-5, rtol=1e-5), (loss, ref)

    # Case 2: N NOT divisible by the row tile (exercises the padded-row mask).
    N2, V2 = 200, 384
    probs2 = jax.random.normal(k3, (N2, V2), dtype=jnp.float32)
    target2 = jax.random.randint(k4, (N2,), 0, V2, dtype=jnp.int32)
    loss2 = jax.block_until_ready(
        nll_label_smoothing(probs2, target2, smoothing=smoothing, block_rows=64))
    ref2 = _reference(probs2, target2, smoothing)
    assert jnp.allclose(loss2, ref2, atol=1e-5, rtol=1e-5), (loss2, ref2)

    print("KERNEL_OK")
</pallas_src>

<mosaic_0001>
module attributes {stable_mosaic.version = 11 : i64} {
  func.func @_nll_smooth_kernel(%arg0: i32, %arg1: memref<64x512xf32, #tpu.memory_space<vmem>>, %arg2: memref<64x1xi32, #tpu.memory_space<vmem>>, %arg3: memref<1x1xf32, #tpu.memory_space<vmem>>, %arg4: memref<1x1xf32, #tpu.memory_space<vmem>>) attributes {dimension_semantics = [#tpu.dimension_semantics<arbitrary>], iteration_bounds = array<i64: 4>, scalar_prefetch = 0 : i64, scratch_operands = 1 : i64, tpu.core_type = #tpu.core_type<tc>, window_params = [{transform_indices = @transform_0, window_bounds = array<i64: 64, 512>}, {transform_indices = @transform_1, window_bounds = array<i64: 64, 1>}, {pipeline_mode = #tpu.pipeline_mode<synchronous>, transform_indices = @transform_2, window_bounds = array<i64: 1, 1>}]} {
    %c0_i32 = arith.constant 0 : i32
    %0 = arith.cmpi eq, %arg0, %c0_i32 : i32
    %1 = arith.extui %0 : i1 to i32
    %c0_i32_0 = arith.constant 0 : i32
    %2 = arith.cmpi ne, %1, %c0_i32_0 : i32
    scf.if %2 {
      %cst_18 = arith.constant 0.000000e+00 : f32
      %50 = vector.broadcast %cst_18 : f32 to vector<1x1xf32>
      %c0_19 = arith.constant 0 : index
      %c0_20 = arith.constant 0 : index
      %51 = vector.load %arg4[%c0_19, %c0_20] : memref<1x1xf32, #tpu.memory_space<vmem>>, vector<1x1xf32>
      tpu.vector_store %arg4[%c0_19, %c0_20], %50 {strides = array<i32>} : memref<1x1xf32, #tpu.memory_space<vmem>>, vector<1x1xf32>,
    } else {
    }
    %c0 = arith.constant 0 : index
    %c0_1 = arith.constant 0 : index
    %3 = vector.load %arg1[%c0, %c0_1] : memref<64x512xf32, #tpu.memory_space<vmem>>, vector<64x512xf32>
    %cst = arith.constant dense<0xFF800000> : vector<64xf32>
    %4 = vector.multi_reduction <maximumf>, %3, %cst [1] : vector<64x512xf32> to vector<64xf32>
    %5 = vector.shape_cast %4 : vector<64xf32> to vector<64x1xf32>
    %6 = vector.broadcast %5 : vector<64x1xf32> to vector<64x512xf32>
    %7 = arith.subf %3, %6 : vector<64x512xf32>
    %8 = math.exp %7 : vector<64x512xf32>
    %cst_2 = arith.constant dense<0.000000e+00> : vector<64xf32>
    %9 = vector.multi_reduction <add>, %8, %cst_2 [1] : vector<64x512xf32> to vector<64xf32>
    %10 = vector.shape_cast %9 : vector<64xf32> to vector<64x1xf32>
    %11 = math.log %10 : vector<64x1xf32>
    %12 = tpu.iota {dimensions = array<i32: 1>} : vector<64x512xi32>
    %c0_3 = arith.constant 0 : index
    %c0_4 = arith.constant 0 : index
    %13 = vector.load %arg2[%c0_3, %c0_4] : memref<64x1xi32, #tpu.memory_space<vmem>>, vector<64x1xi32>
    %14 = vector.broadcast %13 : vector<64x1xi32> to vector<64x512xi32>
    %15 = arith.cmpi eq, %12, %14 : vector<64x512xi32>
    %cst_5 = arith.constant 0.000000e+00 : f32
    %16 = vector.broadcast %cst_5 : f32 to vector<64x512xf32>
    %17 = arith.select %15, %7, %16 : vector<64x512xi1>, vector<64x512xf32>
    %cst_6 = arith.constant dense<0.000000e+00> : vector<64xf32>
    %18 = vector.multi_reduction <add>, %17, %cst_6 [1] : vector<64x512xf32> to vector<64xf32>
    %19 = vector.shape_cast %18 : vector<64xf32> to vector<64x1xf32>
    %20 = arith.subf %11, %19 : vector<64x1xf32>
    %cst_7 = arith.constant dense<0.000000e+00> : vector<64xf32>
    %21 = vector.multi_reduction <add>, %7, %cst_7 [1] : vector<64x512xf32> to vector<64xf32>
    %22 = vector.shape_cast %21 : vector<64xf32> to vector<64x1xf32>
    %cst_8 = arith.constant 0.001953125 : f32
    %23 = vector.broadcast %cst_8 : f32 to vector<64x1xf32>
    %24 = arith.mulf %22, %23 : vector<64x1xf32>
    %25 = arith.subf %11, %24 : vector<64x1xf32>
    %cst_9 = arith.constant 0.899999976 : f32
    %26 = vector.broadcast %cst_9 : f32 to vector<64x1xf32>
    %27 = arith.mulf %26, %20 : vector<64x1xf32>
    %cst_10 = arith.constant 1.000000e-01 : f32
    %28 = vector.broadcast %cst_10 : f32 to vector<64x1xf32>
    %29 = arith.mulf %28, %25 : vector<64x1xf32>
    %30 = arith.addf %27, %29 : vector<64x1xf32>
    %c64_i32 = arith.constant 64 : i32
    %31 = arith.muli %arg0, %c64_i32 : i32
    %32 = tpu.iota {dimensions = array<i32: 0>} : vector<64x1xi32>
    %33 = vector.broadcast %31 : i32 to vector<64x1xi32>
    %34 = arith.addi %33, %32 : vector<64x1xi32>
    %c256_i32 = arith.constant 256 : i32
    %35 = vector.broadcast %c256_i32 : i32 to vector<64x1xi32>
    %36 = arith.cmpi slt, %34, %35 : vector<64x1xi32>
    %cst_11 = arith.constant 0.000000e+00 : f32
    %37 = vector.broadcast %cst_11 : f32 to vector<64x1xf32>
    %38 = arith.select %36, %30, %37 : vector<64x1xi1>, vector<64x1xf32>
    %c0_12 = arith.constant 0 : index
    %c0_13 = arith.constant 0 : index
    %39 = vector.load %arg4[%c0_12, %c0_13] : memref<1x1xf32, #tpu.memory_space<vmem>>, vector<1x1xf32>
    %40 = vector.shape_cast %38 : vector<64x1xf32> to vector<1x64x1xf32>
    %cst_14 = arith.constant dense<0.000000e+00> : vector<1xf32>
    %41 = vector.multi_reduction <add>, %40, %cst_14 [1, 2] : vector<1x64x1xf32> to vector<1xf32>
    %42 = vector.shape_cast %41 : vector<1xf32> to vector<1x1x1xf32>
    %43 = vector.extract %42[0, 0, 0] : f32 from vector<1x1x1xf32>
    %44 = vector.broadcast %43 : f32 to vector<1x1xf32>
    %45 = arith.addf %39, %44 : vector<1x1xf32>
    %c0_15 = arith.constant 0 : index
    %c0_16 = arith.constant 0 : index
    %46 = vector.load %arg4[%c0_15, %c0_16] : memref<1x1xf32, #tpu.memory_space<vmem>>, vector<1x1xf32>
    tpu.vector_store %arg4[%c0_15, %c0_16], %45 {strides = array<i32>} : memref<1x1xf32, #tpu.memory_space<vmem>>, vector<1x1xf32>,
    %c3_i32 = arith.constant 3 : i32
    %47 = arith.cmpi eq, %arg0, %c3_i32 : i32
    %48 = arith.extui %47 : i1 to i32
    %c0_i32_17 = arith.constant 0 : i32
    %49 = arith.cmpi ne, %48, %c0_i32_17 : i32
    scf.if %49 {
      %c0_18 = arith.constant 0 : index
      %c0_19 = arith.constant 0 : index
      %50 = vector.load %arg4[%c0_18, %c0_19] : memref<1x1xf32, #tpu.memory_space<vmem>>, vector<1x1xf32>
      %cst_20 = arith.constant 3.906250e-03 : f32
      %51 = vector.broadcast %cst_20 : f32 to vector<1x1xf32>
      %52 = arith.mulf %50, %51 : vector<1x1xf32>
      %c0_21 = arith.constant 0 : index
      %c0_22 = arith.constant 0 : index
      %53 = vector.load %arg3[%c0_21, %c0_22] : memref<1x1xf32, #tpu.memory_space<vmem>>, vector<1x1xf32>
      tpu.vector_store %arg3[%c0_21, %c0_22], %52 {strides = array<i32>} : memref<1x1xf32, #tpu.memory_space<vmem>>, vector<1x1xf32>,
    } else {
    }
    return
  }
  func.func @transform_0(%arg0: i32) -> (i32, i32) {
    %c0_i32 = arith.constant 0 : i32
    %c0_i32_0 = arith.constant 0 : i32
    return %arg0, %c0_i32 : i32, i32
  }
  func.func @transform_1(%arg0: i32) -> (i32, i32) {
    %c0_i32 = arith.constant 0 : i32
    %c0_i32_0 = arith.constant 0 : i32
    return %arg0, %c0_i32 : i32, i32
  }
  func.func @transform_2(%arg0: i32) -> (i32, i32) {
    %c0_i32 = arith.constant 0 : i32
    %c0_i32_0 = arith.constant 0 : i32
    %c0_i32_1 = arith.constant 0 : i32
    return %c0_i32, %c0_i32_0 : i32, i32
  }
}

</mosaic_0001>

<bundles_post_ra>
// kernel: tpu_custom_call.1
= control target key start
LH: loop header
LB: loop body
LE: loop exit
PB: predicated region body
PF: predicated region fallthrough
CT: control target
= control target key end

     0   :  { %7 = vsyncpa [#allocation4], 0  ;;  %s1652_s0 = inlined_call_operand.hbm [shape: f32[256,512], index: 0, kind: input, shape index: {}]   ;;  %s1653_s1 = inlined_call_operand.vmem [shape: s32[256,1], index: 1, kind: input, shape index: {}]   ;;  %s1654_s2 = inlined_call_operand.hbm [shape: f32[1,1], index: 2, kind: output, shape index: {}]  }
   0x1   :  { %9 = vsyncpa [#allocation4 + $0x1], 0 }
   0x2   :  { %10 = vsyncpa [#allocation5], 0  ;;  %s1051_s9 = smov 0   ;;  %s1053_s10 = smov 0  }
   0x3   :  { %s1055_s11 = smov 0   ;;  %s1057_s12 = smov 0  }
   0x4 LB: > { %s1070_s13 = sadd.s32 4294967295, %s1029_s12   ;;  %s1073_s14 = sadd.s32 1, %s1029_s12   ;;  %s1029_s12 = sphi %s1057_s12, %s1661_s12   ;;  %s1025_s11 = sphi %s1055_s11, %s1660_s11   ;;  %s1021_s10 = sphi %s1053_s10, %s1659_s10   ;;  %s1017_s9 = sphi %s1051_s9, %s1658_s9  }
   0x5   : > { %s20_s15 = ssub.s32 %s1029_s12, %s1073_s14  ;;  %s23_s16 = sadd.s32 1, %s1025_s11 }
   0x6   : > { %p21_p0 = scmp.eq.s32.totalorder %s20_s15, 0  ;;  %p30_p1 = scmp.ne.s32.totalorder %s1025_s11, %s1021_s10 }
   0x7   : > { %p31_p2 = scmp.eq.s32.totalorder %s1029_s12, 0  ;;  %p36_p3 = scmp.ne.s32.totalorder %s1021_s10, %s1017_s9 }
   0x8   : > { %s1083_s17 = scalar_select %p21_p0, %s1025_s11, %s23_s16  }
   0x9   : > { %p1085_p4 = por %p31_p2, %p30_p1  ;;  %p37_p5 = scmp.eq.s32.totalorder %s1070_s13, 0 }
   0xa   : > { %p810_p6 = scmp.lt.s32.totalorder %s1029_s12, 4  ;;  %s107_s20 = sand.u32 1, %s1025_s11  }
   0xb   : > { %p1091_p7 = por %p37_p5, %p36_p3  ;;  %s781_s21 = sshll.u32 %s107_s20, 8 }
   0xc   : > { %s797_s22 = sshll.u32 %s1029_s12, 8  ;;  %s111_s26 = scalar_lea.vmem [#allocation3], %s781_s21 }
   0xd   : > { %s117_s25 = scalar_lea.hbm %s1652_s0, %s797_s22  ;;  %s120_s27 = sshll.u32 %s111_s26, 4  ;;  %s121_s27 = int_to_ptr.vmem [resolvable:$true] %s120_s27 }
   0xe   : > { %s118_s28 = sshll.u32 %s117_s25, 4  ;;  %p1102_p8 = pnand %p810_p6, %p1085_p4  ;;  %s119_s28 = int_to_ptr.hbm [resolvable:$true] %s118_s28 }
   0xf   : > { %p785_p9 = scmp.ge.s32.totalorder %s1029_s12, 1  ;;  %s108_s30 = scalar_lea.sflag [#allocation4], %s107_s20 }
  0x10   : > { %s933_s3 = sshra.s32 %s119_s28, 4  ;;  %p937_p11 = pneg %p1102_p8  ;;  %s934_s3 = int_to_ptr.hbm [resolvable:$true] %s933_s3 }
  0x11   : > { %s935_s4 = scalar_lea.hbm %s934_s3, 256  ;;  %s940_s7 = scalar_lea.hbm %s1652_s0, 1024 }
  0x12   : > { %p936_p10 = scmp.ne.s32.totalorder %s934_s3, %s935_s4  ;;  %p941_p0 = scmp.lt.s32.totalorder %s934_s3, %s1652_s0 }
  0x13   : > { %p942_p1 = scmp.lt.s32.totalorder %s940_s7, %s935_s4 }
  0x14   : > { %p938_p12 = pnand %p937_p11, %p936_p10 }
  0x15   : > { %p943_p2 = por %p942_p1, %p941_p0 }
  0x16   : > { %p939_p13 = pneg %p938_p12 }
  0x18   : > { %p944_p3 = pnand %p943_p2, %p939_p13 }
  0x1a   : > { %947 = shalt.err (!%p944_p3)
}
  0x1b   : > { %s1031_s15 = smov 512   ;;  %s1032_s16 = smov 32  }
  0x1c   : > { %809 = dma.hbm_to_vmem [thread:$0]  (!%p1102_p8), %s119_s28, 4096, %s121_s27, %s108_s30, %s1031_s15, %s1031_s15, %s1032_s16  }
  0x1d   : > { %p137_p4 = scmp.lt.s32.totalorder %s1029_s12, 5 }
  0x1f   : > { %p138_p5 = pnand %p785_p9, %p137_p4 }
  0x20   : > { %s143_s18 = sand.u32 (!%p138_p5), 1, %s1021_s10  }
  0x21   : > { %141 = sbr.rel (%p138_p5) target bundleno = 590 (0x24e), region = 28  ;;  %s786_s20 = sshll.u32 (!%p138_p5), %s143_s18, 8 }
  0x22   : > { %s144_s21 = scalar_lea.sflag (!%p138_p5), [#allocation4], %s143_s18  ;;  %s1121_s22 = scalar_lea.vmem (!%p138_p5), [#allocation3], %s786_s20 }
  0x26   : > { %1008 = dma.done.wait (%p1091_p7), %s144_s21, 4096  }
  0x27   : > { %1010 = vsyncadd (%p1091_p7), %s144_s21, 4294963200  ;;  %s787_s23 = sshll.u32 %s1070_s13, 3  ;;  %p789_p8 = scmp.ne.s32.totalorder %s1070_s13, 0 }
  0x28   : > { %p171_p6 = scmp.lt.s32.totalorder %s787_s23, 31 }
  0x29   : > { %179 = sbr.rel (%p789_p8) target bundleno = 48 (0x30), region = 36 }
  0x2a   : > { %s1663_s23 = smov (!%p171_p6, %s787_s23), 31 }
  0x2b   : > { %s788_s24 = sshll.u32 %s1663_s23, 3 }
  0x2c   : > { %s1131_s26 = scalar_lea.vmem %s1653_s1, %s788_s24 }
  0x2e   : > { %vm180_vm0 = vcmask 0   ;;  %v1033_v0 = vmov 0.0  }
  0x2f   : > { %181 = vst.msk [vmem:[#allocation2] sm:$0x1] %vm180_vm0, %v1033_v0 }
  0x30 PF: > { %v1135_v1 = vld [vmem:[%s1121_s22 + $0x80] sm:$0xff]  ;;  %v1138_v2 = vld [vmem:[%s1121_s22 + $0x88] sm:$0xff]  ;;  %v1141_v3 = vld [vmem:[%s1121_s22 + $0x90] sm:$0xff]  ;;  %v1034_v7 = vmov 0   ;;  %s790_s19 = sshll.u32 %s1070_s13, 6  ;;  %p791_p7 = scmp.ne.s32.totalorder %s1070_s13, 3 }
  0x31   : > { %v234_v4 = vmax.f32 %v1135_v1, %v1138_v2  ;;  %v1146_v5 = vld [vmem:[%s1121_s22 + $0x40] sm:$0xff]  ;;  %v1149_v6 = vld [vmem:[%s1121_s22 + $0x48] sm:$0xff]  ;;  %850 = vset.pattern.permute.xlu2 %v1034_v7  ;;  %851 = vset.pattern.permute.xlu0 %v1034_v7  ;;  %v1152_v8 = vld [vmem:[%s1121_s22 + $0x98] sm:$0xff] }
  0x32   : > { %v1155_v9 = vld [vmem:[%s1121_s22 + $0x50] sm:$0xff]  ;;  %v224_v10 = vmax.f32 %v1146_v5, %v1149_v6  ;;  %v1160_v11 = vld [vmem:[%s1121_s22] sm:$0xff]  ;;  %852 = vset.pattern.permute.xlu1 %v1034_v7  ;;  %v1164_v13 = vld [vmem:[%s1121_s22 + $0x58] sm:$0xff] }
  0x33   : > { %v235_v12 = vmax.f32 %v234_v4, %v1141_v3  ;;  %v1167_v14 = vld [vmem:[%s1121_s22 + $0x8] sm:$0xff]  ;;  %v1170_v15 = vld [vmem:[%s1121_s22 + $0x10] sm:$0xff]  ;;  %v1176_v18 = vld [vmem:[%s1121_s22 + $0xa0] sm:$0xff] }
  0x34   : > { %v225_v16 = vmax.f32 %v224_v10, %v1155_v9  ;;  %v214_v17 = vmax.f32 %v1160_v11, %v1167_v14  ;;  %v1179_v19 = vld [vmem:[%s1121_s22 + $0xa8] sm:$0xff]  ;;  %v1182_v20 = vld [vmem:[%s1121_s22 + $0xb0] sm:$0xff]  ;;  %v1186_v22 = vld [vmem:[%s1121_s22 + $0x18] sm:$0xff] }
  0x35   : > { %v236_v21 = vmax.f32 %v235_v12, %v1152_v8  ;;  %v239_v23 = vmax.f32 %v1176_v18, %v1179_v19  ;;  %v1191_v24 = vld [vmem:[%s1121_s22 + $0x60] sm:$0xff]  ;;  %v1194_v25 = vld [vmem:[%s1121_s22 + $0x68] sm:$0xff]  ;;  %v1199_v28 = vld [vmem:[%s1121_s22 + $0x70] sm:$0xff] }
  0x36   : > { %v226_v26 = vmax.f32 %v225_v16, %v1164_v13  ;;  %v215_v27 = vmax.f32 %v214_v17, %v1170_v15  ;;  %v229_v29 = vmax.f32 %v1191_v24, %v1194_v25  ;;  %v1204_v30 = vld [vmem:[%s1121_s22 + $0x20] sm:$0xff]  ;;  %v1208_v32 = vld [vmem:[%s1121_s22 + $0x28] sm:$0xff]  ;;  %v1211_v33 = vld [vmem:[%s1121_s22 + $0x30] sm:$0xff] }
  0x37   : > { %237 = vmax.xlane.f32.xlu2 %v236_v21  ;;  %v240_v31 = vmax.f32 %v239_v23, %v1182_v20  ;;  %v1215_v35 = vld [vmem:[%s1121_s22 + $0xb8] sm:$0xff]  ;;  %v219_v37 = vmax.f32 %v1204_v30, %v1208_v32  ;;  %v1224_v39 = vld [vmem:[%s1121_s22 + $0xe0] sm:$0xff]  ;;  %v1227_v40 = vld [vmem:[%s1121_s22 + $0xe8] sm:$0xff]  ;;  %v406_v21 = vlaneseq }
  0x38   : > { %227 = vmax.xlane.f32.xlu1 %v226_v26  ;;  %v216_v34 = vmax.f32 %v215_v27, %v1186_v22  ;;  %v230_v36 = vmax.f32 %v229_v29, %v1199_v28  ;;  %v1221_v38 = vld [vmem:[%s1121_s22 + $0x78] sm:$0xff]  ;;  %v1235_v44 = vld [vmem:[%s1121_s22 + $0xc0] sm:$0xff]  ;;  %v1238_v45 = vld [vmem:[%s1121_s22 + $0xc8] sm:$0xff]  ;;  %v249_v47 = vmax.f32 %v1224_v39, %v1227_v40 }
  0x39   : > { %v220_v41 = vmax.f32 %v219_v37, %v1211_v33  ;;  %v241_v42 = vmax.f32 %v240_v31, %v1215_v35  ;;  %v1232_v43 = vld [vmem:[%s1121_s22 + $0x38] sm:$0xff]  ;;  %v1244_v48 = vld [vmem:[%s1121_s22 + $0xf0] sm:$0xff]  ;;  %v244_v50 = vmax.f32 %v1235_v44, %v1238_v45  ;;  %v412_v59 = vld [vmem:[%s1131_s26 + $0x8] sm:$0xff] }
  0x3a   : > { %217 = vmax.xlane.f32.xlu0 %v216_v34  ;;  %v231_v46 = vmax.f32 %v230_v36, %v1221_v38  ;;  %v1250_v51 = vld [vmem:[%s1121_s22 + $0xd0] sm:$0xff]  ;;  %v250_v52 = vmax.f32 %v249_v47, %v1244_v48  ;;  %v1254_v53 = vld [vmem:[%s1121_s22 + $0xf8] sm:$0xff]  ;;  %v416_v63 = vld [vmem:[%s1131_s26 + $0x28] sm:$0xff]  ;;  %v1288_v34 = vand.u32 127, %v406_v21 }
  0x3b   : > { %v221_v49 = vmax.f32 %v220_v41, %v1232_v43  ;;  %v245_v54 = vmax.f32 %v244_v50, %v1250_v51  ;;  %v1258_v55 = vld [vmem:[%s1121_s22 + $0xd8] sm:$0xff]  ;;  %v413_v61 = vld [vmem:[%s1131_s26 + $0x10] sm:$0xff] }
  0x3c   : > { %v251_v56 = vmax.f32 %v250_v52, %v1254_v53  ;;  %v411_v58 = vld [vmem:[%s1131_s26] sm:$0xff]  ;;  %v414_v60 = vld [vmem:[%s1131_s26 + $0x18] sm:$0xff]  ;;  %v417_v0 = vld [vmem:[%s1131_s26 + $0x30] sm:$0xff]  ;;  %v1317_v47 = vadd.s32 128, %v1288_v34 }
  0x3d   : > { %v246_v57 = vmax.f32 %v245_v54, %v1258_v55  ;;  %v415_v62 = vld [vmem:[%s1131_s26 + $0x20] sm:$0xff]  ;;  %v418_v4 = vld [vmem:[%s1131_s26 + $0x38] sm:$0xff] }
  0x3f   : > { %242 = vmax.xlane.f32.xlu2 %v241_v42 }
  0x40   : > { %232 = vmax.xlane.f32.xlu1 %v231_v46 }
  0x42   : > { %222 = vmax.xlane.f32.xlu0 %v221_v49 }
  0x48   : > { %252 = vmax.xlane.f32.xlu1 %v251_v56 }
  0x4a   : > { %247 = vmax.xlane.f32.xlu0 %v246_v57 }
  0x57   : > { %420 = vperm.xlu2 %850, %v411_v58  }
  0x5e   : > { %423 = vperm.xlu0 %851, %v412_v59  }
  0x5f   : > { %429 = vperm.xlu2 %850, %v414_v60  }
  0x61   : > { %426 = vperm.xlu1 %852, %v413_v61  }
  0x67   : > { %432 = vperm.xlu2 %850, %v415_v62  }
  0x69   : > { %435 = vperm.xlu1 %852, %v416_v63  }
  0x6f   : > { %438 = vperm.xlu2 %850, %v417_v0  }
  0x71   : > { %441 = vperm.xlu1 %852, %v418_v4  }
  0xaa   : > { %v238_v7 = vpop.xlane.xlu2 %237 }
  0xab   : > { %v228_v10 = vpop.xlane.xlu1 %227  ;;  %v1295_v36 = vsub.f32 %v1135_v1, %v238_v7 }
  0xac   : > { %v1271_v12 = vsub.f32 %v1146_v5, %v228_v10  ;;  %v1274_v16 = vsub.f32 %v1149_v6, %v228_v10  ;;  %v1277_v23 = vsub.f32 %v1155_v9, %v228_v10  ;;  %v1291_v6 = vsub.f32 %v1164_v13, %v228_v10 }
  0xad   : > { %v218_v17 = vpop.xlane.xlu0 %217 }
  0xae   : > { %v565_v26 = vadd.f32 %v1274_v16, %v1271_v12  ;;  %v254_v27 = vsub.f32 %v1160_v11, %v218_v17  ;;  %v1283_v29 = vsub.f32 %v1167_v14, %v218_v17  ;;  %v1299_v14 = vsub.f32 %v1138_v2, %v238_v7 }
  0xaf   : > { %v1311_v46 = vsub.f32 %v1170_v15, %v218_v17  ;;  %v1320_v2 = vadd.s32 256, %v1288_v34  ;;  %v1330_v15 = vadd.s32 384, %v1288_v34  ;;  %v1334_v49 = vsub.f32 %v1186_v22, %v218_v17 }
  0xb0   : > { %v566_v9 = vadd.f32 %v565_v26, %v1277_v23  ;;  %v555_v11 = vadd.f32 %v1283_v29, %v254_v27  ;;  %v286_v54 = vmul.f32 1.442695, %v254_v27  ;;  %v288_v58 = vmul.f32 1.442695, %v1283_v29 }
  0xb1   : > { %v302_v61 = vmul.f32 1.442695, %v1271_v12  ;;  %v575_v63 = vadd.f32 %v1299_v14, %v1295_v36 }
  0xb2   : > { %v1285_v31 = vpop.xlane.xlu2 %242  ;;  %v556_v52 = vadd.f32 %v555_v11, %v1311_v46 }
  0xb3   : > { %v233_v5 = vpop.xlane.xlu1 %232  ;;  %v1359_v62 = vsub.f32 %v1176_v18, %v1285_v31  ;;  %v1368_v4 = vsub.f32 %v1179_v19, %v1285_v31  ;;  %v1375_v18 = vmul.f32 1.442695, %v1277_v23 }
  0xb4   : > { %v1302_v41 = vsub.f32 %v1191_v24, %v233_v5  ;;  %v1305_v42 = vsub.f32 %v1194_v25, %v233_v5  ;;  %v1323_v24 = vsub.f32 %v1141_v3, %v238_v7  ;;  %v1326_v25 = vsub.f32 %v1152_v8, %v238_v7 }
  0xb5   : > { %v223_v37 = vpop.xlane.xlu0 %222  ;;  %v1337_v50 = vsub.f32 %v1199_v28, %v233_v5  ;;  %v320_v3 = vmul.f32 1.442695, %v1299_v14  ;;  %v1347_v22 = vsub.f32 %v1221_v38, %v233_v5  ;;  %v557_v59 = vadd.f32 %v556_v52, %v1334_v49 }
  0xb6   : > { %v1308_v13 = vsub.f32 %v1204_v30, %v223_v37  ;;  %v1314_v1 = vsub.f32 %v1208_v32, %v223_v37  ;;  %v567_v30 = vadd.f32 %v566_v9, %v1291_v6  ;;  %v318_v32 = vmul.f32 1.442695, %v1295_v36 }
  0xb7   : > { %v570_v56 = vadd.f32 %v1305_v42, %v1302_v41  ;;  %v1350_v28 = vsub.f32 %v1211_v33, %v223_v37  ;;  %v1354_v60 = vmul.f32 1.442695, %v1323_v24  ;;  %v304_v38 = vmul.f32 1.442695, %v1274_v16  ;;  %558 = vadd.xlane.f32.xlu1 %v557_v59 }
  0xb8   : > { %568 = vadd.xlane.f32.xlu0 %v567_v30  ;;  %v560_v57 = vadd.f32 %v1314_v1, %v1308_v13  ;;  %853 = vpow2.f32 %v318_v32  ;;  %v1371_v7 = vsub.f32 %v1232_v43, %v223_v37  ;;  %v326_v26 = vmul.f32 1.442695, %v1359_v62 }
  0xb9   : > { %v571_v33 = vadd.f32 %v570_v56, %v1337_v50  ;;  %855 = vpow2.f32 %v286_v54  ;;  %v576_v43 = vadd.f32 %v575_v63, %v1323_v24  ;;  %v290_v5 = vmul.f32 1.442695, %v1311_v46 }
  0xba   : > { %v421_v8 = vpop.permute.xlu2 %420  ;;  %v561_v0 = vadd.f32 %v560_v57, %v1350_v28  ;;  %857 = vpow2.f32 %v288_v58  ;;  %v328_v37 = vmul.f32 1.442695, %v1368_v4  ;;  %v294_v54 = vmul.f32 1.442695, %v1308_v13 }
  0xbb   : > { %vm443_vm1 = vcmp.eq.s32.totalorder %v1288_v34, %v421_v8  ;;  %vm444_vm2 = vcmp.eq.s32.totalorder %v1317_v47, %v421_v8  ;;  %v1378_v10 = vpop.xlane.xlu1 %252  ;;  %v572_v17 = vadd.f32 %v571_v33, %v1347_v22  ;;  %859 = vpow2.f32 %v320_v3 }
  0xbc   : > { %v562_v19 = vadd.f32 %v561_v0, %v1371_v7  ;;  %861 = vpow2.f32 %v302_v61  ;;  %vm445_vm3 = vcmp.eq.s32.totalorder %v1320_v2, %v421_v8  ;;  %v475_v9 = vsel %vm443_vm1, %v254_v27, 0.0 }
  0xbd   : > { %863 = vpow2.f32 %v304_v38  ;;  %v1389_v11 = vsub.f32 %v1224_v39, %v1378_v10  ;;  %v1391_v30 = vpop.xlane.xlu0 %247  ;;  %v476_v52 = vsel %vm444_vm2, %v1283_v29, 0.0  ;;  %v1402_v27 = vsub.f32 %v1182_v20, %v1285_v31 }
  0xbe   : > { %563 = vadd.xlane.f32.xlu2 %v562_v19  ;;  %v1398_v3 = vpop.eup %853  ;;  %vm446_vm4 = vcmp.eq.s32.totalorder %v1330_v15, %v421_v8  ;;  %v507_v39 = vadd.f32 %v476_v52, %v475_v9  ;;  %865 = vpow2.f32 %v326_v26  ;;  %v296_v57 = vmul.f32 1.442695, %v1314_v1 }
  0xbf   : > { %v856_v56 = vpop.eup %855  ;;  %v577_v58 = vadd.f32 %v576_v43, %v1326_v25  ;;  %v477_v29 = vsel %vm445_vm3, %v1311_v46, 0.0  ;;  %v1413_v20 = vsub.f32 %v1235_v44, %v1391_v30  ;;  %867 = vpow2.f32 %v290_v5 }
  0xc0   : > { %573 = vadd.xlane.f32.xlu0 %v572_v17  ;;  %v858_v59 = vpop.eup %857  ;;  %v508_v61 = vadd.f32 %v507_v39, %v477_v29  ;;  %v292_v63 = vmul.f32 1.442695, %v1334_v49  ;;  %869 = vpow2.f32 %v328_v37  ;;  %v342_v33 = vmul.f32 1.442695, %v1389_v11 }
  0xc1   : > { %v860_v38 = vpop.eup %859  ;;  %v1419_v0 = vsub.f32 %v1238_v45, %v1391_v30  ;;  %v478_v46 = vsel %vm446_vm4, %v1334_v49, 0.0  ;;  %v1426_v44 = vsub.f32 %v1215_v35, %v1285_v31  ;;  %v1429_v26 = vmul.f32 1.442695, %v1402_v27 }
  0xc2   : > { %v1393_v32 = vpop.permute.xlu2 %429  ;;  %v862_v17 = vpop.eup %861  ;;  %871 = vpow2.f32 %v294_v54  ;;  %v509_v19 = vadd.f32 %v508_v61, %v478_v46  ;;  %v1432_v5 = vmul.f32 1.442695, %v1302_v41  ;;  %v1435_v45 = vmul.f32 1.442695, %v1305_v42 }
  0xc3   : > { %v864_v43 = vpop.eup %863  ;;  %873 = vpow2.f32 %v296_v57  ;;  %v350_v8 = vadd.f32 %v858_v59, %v856_v56  ;;  %v1439_v49 = vsub.f32 %v1227_v40, %v1378_v10  ;;  %v334_v35 = vmul.f32 1.442695, %v1413_v20 }
  0xc4   : > { %510 = vadd.xlane.f32.xlu1 %v509_v19  ;;  %875 = vpow2.f32 %v292_v63  ;;  %v324_v31 = vmul.f32 1.442695, %v1326_v25  ;;  %v1443_v9 = vpop.eup %865  ;;  %v1447_v37 = vsub.f32 %v1244_v48, %v1378_v10  ;;  %v336_v52 = vmul.f32 1.442695, %v1419_v0 }
  0xc5   : > { %877 = vpow2.f32 %v342_v33  ;;  %v308_v40 = vmul.f32 1.442695, %v1291_v6  ;;  %v868_v39 = vpop.eup %867  ;;  %v1464_v59 = vsub.f32 %v1254_v53, %v1378_v10  ;;  %v344_v63 = vmul.f32 1.442695, %v1439_v49 }
  0xc6   : > { %879 = vpow2.f32 %v1354_v60  ;;  %v1455_v56 = vpop.eup %869  ;;  %v351_v48 = vadd.f32 %v868_v39, %v350_v8  ;;  %v1479_v53 = vsub.f32 %v1258_v55, %v1391_v30  ;;  %v370_v33 = vadd.f32 %v860_v38, %v1398_v3 }
  0xc7   : > { %881 = vpow2.f32 %v1375_v18  ;;  %vm455_vm12 = vcmp.eq.s32.totalorder %v1288_v34, %v1393_v32  ;;  %vm456_vm0 = vcmp.eq.s32.totalorder %v1317_v47, %v1393_v32  ;;  %vm457_vm2 = vcmp.eq.s32.totalorder %v1320_v2, %v1393_v32 }
  0xc8   : > { %578 = vadd.xlane.f32.xlu0 %v577_v58  ;;  %v1460_v58 = vpop.eup %871  ;;  %883 = vpow2.f32 %v334_v35  ;;  %v360_v35 = vadd.f32 %v864_v43, %v862_v17 }
  0xc9   : > { %v1467_v60 = vpop.eup %873  ;;  %885 = vpow2.f32 %v336_v52 }
  0xca   : > { %v433_v54 = vpop.permute.xlu2 %432  ;;  %v876_v18 = vpop.eup %875  ;;  %887 = vpow2.f32 %v324_v31  ;;  %v332_v31 = vmul.f32 1.442695, %v1426_v44 }
  0xcb   : > { %vm459_vm5 = vcmp.eq.s32.totalorder %v1288_v34, %v433_v54  ;;  %vm460_vm6 = vcmp.eq.s32.totalorder %v1317_v47, %v433_v54  ;;  %vm461_vm7 = vcmp.eq.s32.totalorder %v1320_v2, %v433_v54  ;;  %vm462_vm8 = vcmp.eq.s32.totalorder %v1330_v15, %v433_v54  ;;  %v1482_v46 = vpop.eup %877 }
  0xcc   : > { %v491_v57 = vsel %vm459_vm5, %v1295_v36, 0.0  ;;  %v492_v29 = vsel %vm460_vm6, %v1299_v14, 0.0  ;;  %v1472_v36 = vsub.f32 %v1250_v51, %v1391_v30  ;;  %v493_v14 = vsel %vm461_vm7, %v1323_v24, 0.0  ;;  %v880_v52 = vpop.eup %879 }
  0xcd   : > { %v527_v61 = vadd.f32 %v492_v29, %v491_v57  ;;  %v352_v19 = vadd.f32 %v876_v18, %v351_v48  ;;  %v494_v51 = vsel %vm462_vm8, %v1326_v25, 0.0  ;;  %889 = vpow2.f32 %v308_v40  ;;  %v882_v55 = vpop.eup %881 }
  0xce   : > { %v338_v30 = vmul.f32 1.442695, %v1472_v36  ;;  %v884_v38 = vpop.eup %883  ;;  %891 = vpow2.f32 %v1429_v26  ;;  %v371_v40 = vadd.f32 %v880_v52, %v370_v33  ;;  %v361_v48 = vadd.f32 %v882_v55, %v360_v35 }
  0xcf   : > { %v528_v10 = vadd.f32 %v527_v61, %v493_v14  ;;  %v886_v54 = vpop.eup %885  ;;  %v340_v14 = vmul.f32 1.442695, %v1479_v53  ;;  %v487_v52 = vsel %vm455_vm12, %v1302_v41, 0.0  ;;  %vm458_vm12 = vcmp.eq.s32.totalorder %v1330_v15, %v1393_v32 }
  0xd0   : > { %v424_v8 = vpop.permute.xlu0 %423  ;;  %353 = vadd.xlane.f32.xlu0 %v352_v19  ;;  %893 = vpow2.f32 %v338_v30  ;;  %v346_v19 = vmul.f32 1.442695, %v1447_v37  ;;  %v380_v35 = vadd.f32 %v886_v54, %v884_v38  ;;  %v298_v54 = vmul.f32 1.442695, %v1350_v28 }
  0xd1   : > { %vm447_vm9 = vcmp.eq.s32.totalorder %v1288_v34, %v424_v8  ;;  %vm448_vm10 = vcmp.eq.s32.totalorder %v1317_v47, %v424_v8  ;;  %v529_v24 = vadd.f32 %v528_v10, %v494_v51  ;;  %vm449_vm11 = vcmp.eq.s32.totalorder %v1320_v2, %v424_v8 }
  0xd2   : > { %v479_v3 = vsel %vm447_vm9, %v1308_v13, 0.0  ;;  %v480_v25 = vsel %vm448_vm10, %v1314_v1, 0.0  ;;  %vm450_vm13 = vcmp.eq.s32.totalorder %v1330_v15, %v424_v8  ;;  %v481_v13 = vsel %vm449_vm11, %v1350_v28, 0.0  ;;  %v888_v1 = vpop.eup %887  ;;  %v1507_v18 = vpop.permute.xlu2 %438 }
  0xd3   : > { %v427_v17 = vpop.permute.xlu1 %426  ;;  %530 = vadd.xlane.f32.xlu1 %v529_v24  ;;  %v512_v43 = vadd.f32 %v480_v25, %v479_v3  ;;  %v890_v57 = vpop.eup %889  ;;  %v482_v29 = vsel %vm450_vm13, %v1371_v7, 0.0  ;;  %895 = vpow2.f32 %v332_v31  ;;  %v372_v8 = vadd.f32 %v888_v1, %v371_v40 }
  0xd4   : > { %vm451_vm14 = vcmp.eq.s32.totalorder %v1288_v34, %v427_v17  ;;  %vm452_vm15 = vcmp.eq.s32.totalorder %v1317_v47, %v427_v17  ;;  %vm453_vm1 = vcmp.eq.s32.totalorder %v1320_v2, %v427_v17  ;;  %897 = vpow2.f32 %v344_v63  ;;  %v892_v51 = vpop.eup %891 }
  0xd5   : > { %v513_v39 = vadd.f32 %v512_v43, %v481_v13  ;;  %v483_v26 = vsel %vm451_vm14, %v1271_v12, 0.0  ;;  %v484_v61 = vsel %vm452_vm15, %v1274_v16, 0.0  ;;  %v375_v12 = vadd.f32 %v1455_v56, %v1443_v9 }
  0xd6   : > { %v517_v33 = vadd.f32 %v484_v61, %v483_v26  ;;  %v362_v16 = vadd.f32 %v890_v57, %v361_v48  ;;  %vm467_vm3 = vcmp.eq.s32.totalorder %v1288_v34, %v1507_v18  ;;  %v485_v63 = vsel %vm453_vm1, %v1277_v23, 0.0  ;;  %v894_v55 = vpop.eup %893 }
  0xd7   : > { %v514_v10 = vadd.f32 %v513_v39, %v482_v29  ;;  %899 = vpow2.f32 %v340_v14  ;;  %v488_v9 = vsel %vm456_vm0, %v1305_v42, 0.0  ;;  %vm468_vm4 = vcmp.eq.s32.totalorder %v1317_v47, %v1507_v18 }
  0xd8   : > { %373 = vadd.xlane.f32.xlu0 %v372_v8  ;;  %vm454_vm5 = vcmp.eq.s32.totalorder %v1330_v15, %v427_v17  ;;  %v518_v41 = vadd.f32 %v517_v33, %v485_v63  ;;  %v348_v24 = vmul.f32 1.442695, %v1464_v59  ;;  %v376_v23 = vadd.f32 %v892_v51, %v375_v12 }
  0xd9   : > { %515 = vadd.xlane.f32.xlu2 %v514_v10  ;;  %901 = vpow2.f32 %v346_v19  ;;  %v896_v30 = vpop.eup %895  ;;  %v381_v25 = vadd.f32 %v894_v55, %v380_v35  ;;  %v499_v38 = vsel %vm467_vm3, %v1413_v20, 0.0  ;;  %v486_v43 = vsel %vm454_vm5, %v1291_v6, 0.0 }
  0xda   : > { %v898_v17 = vpop.eup %897  ;;  %vm469_vm9 = vcmp.eq.s32.totalorder %v1320_v2, %v1507_v18  ;;  %v519_v40 = vadd.f32 %v518_v41, %v486_v43  ;;  %v522_v13 = vadd.f32 %v488_v9, %v487_v52  ;;  %v500_v1 = vsel %vm468_vm4, %v1419_v0, 0.0 }
  0xdb   : > { %v436_v56 = vpop.permute.xlu1 %435  ;;  %363 = vadd.xlane.f32.xlu1 %v362_v16  ;;  %v377_v48 = vadd.f32 %v896_v30, %v376_v23  ;;  %v489_v6 = vsel %vm457_vm2, %v1337_v50, 0.0  ;;  %903 = vpow2.f32 %v348_v24  ;;  %v537_v26 = vadd.f32 %v500_v1, %v499_v38 }
  0xdc   : > { %vm463_vm6 = vcmp.eq.s32.totalorder %v1288_v34, %v436_v56  ;;  %vm464_vm7 = vcmp.eq.s32.totalorder %v1317_v47, %v436_v56  ;;  %vm465_vm8 = vcmp.eq.s32.totalorder %v1320_v2, %v436_v56  ;;  %v385_v29 = vadd.f32 %v898_v17, %v1482_v46 }
  0xdd   : > { %v495_v42 = vsel %vm463_vm6, %v1359_v62, 0.0  ;;  %v496_v3 = vsel %vm464_vm7, %v1368_v4, 0.0  ;;  %v900_v39 = vpop.eup %899  ;;  %v497_v57 = vsel %vm465_vm8, %v1402_v27, 0.0  ;;  %v501_v61 = vsel %vm469_vm9, %v1472_v36, 0.0 }
  0xde   : > { %v532_v31 = vadd.f32 %v496_v3, %v495_v42  ;;  %v382_v28 = vadd.f32 %v900_v39, %v381_v25  ;;  %vm466_vm10 = vcmp.eq.s32.totalorder %v1330_v15, %v436_v56  ;;  %vm470_vm11 = vcmp.eq.s32.totalorder %v1330_v15, %v1507_v18 }
  0xdf   : > { %v902_v14 = vpop.eup %901  ;;  %v538_v33 = vadd.f32 %v537_v26, %v501_v61  ;;  %v523_v19 = vadd.f32 %v522_v13, %v489_v6  ;;  %v314_v8 = vmul.f32 1.442695, %v1337_v50  ;;  %905 = vpow2.f32 %v298_v54 }
  0xe0   : > { %378 = vadd.xlane.f32.xlu0 %v377_v48  ;;  %v533_v10 = vadd.f32 %v532_v31, %v497_v57  ;;  %v300_v46 = vmul.f32 1.442695, %v1371_v7  ;;  %907 = vpow2.f32 %v1432_v5  ;;  %v498_v12 = vsel %vm466_vm10, %v1426_v44, 0.0 }
  0xe1   : > { %520 = vadd.xlane.f32.xlu2 %v519_v40  ;;  %v386_v51 = vadd.f32 %v902_v14, %v385_v29  ;;  %v502_v16 = vsel %vm470_vm11, %v1479_v53, 0.0  ;;  %v904_v35 = vpop.eup %903  ;;  %909 = vpow2.f32 %v1435_v45  ;;  %v490_v52 = vsel %vm458_vm12, %v1347_v22, 0.0 }
  0xe2   : > { %v534_v18 = vadd.f32 %v533_v10, %v498_v12  ;;  %v539_v32 = vadd.f32 %v538_v33, %v502_v16  ;;  %v524_v63 = vadd.f32 %v523_v19, %v490_v52  ;;  %v355_v50 = vadd.f32 %v1467_v60, %v1460_v58 }
  0xe3   : > { %383 = vadd.xlane.f32.xlu1 %v382_v28  ;;  %v442_v9 = vpop.permute.xlu1 %441  ;;  %v590_v7 = vadd.f32 %v1439_v49, %v1389_v11  ;;  %911 = vpow2.f32 %v300_v46  ;;  %v387_v5 = vadd.f32 %v904_v35, %v386_v51  ;;  %v585_v56 = vadd.f32 %v1419_v0, %v1413_v20 }
  0xe4   : > { %913 = vpow2.f32 %v314_v8  ;;  %v316_v45 = vmul.f32 1.442695, %v1347_v22  ;;  %vm471_vm13 = vcmp.eq.s32.totalorder %v1288_v34, %v442_v9  ;;  %vm472_vm14 = vcmp.eq.s32.totalorder %v1317_v47, %v442_v9 }
  0xe5   : > { %v906_v41 = vpop.eup %905  ;;  %v591_v55 = vadd.f32 %v590_v7, %v1447_v37  ;;  %v586_v23 = vadd.f32 %v585_v56, %v1472_v36  ;;  %v503_v20 = vsel %vm471_vm13, %v1389_v11, 0.0  ;;  %v504_v0 = vsel %vm472_vm14, %v1439_v49, 0.0 }
  0xe6   : > { %v908_v24 = vpop.eup %907  ;;  %v356_v58 = vadd.f32 %v906_v41, %v355_v50  ;;  %915 = vpow2.f32 %v316_v45  ;;  %vm473_vm15 = vcmp.eq.s32.totalorder %v1320_v2, %v442_v9  ;;  %v542_v25 = vadd.f32 %v504_v0, %v503_v20 }
  0xe7   : > { %v910_v60 = vpop.eup %909  ;;  %v592_v34 = vadd.f32 %v591_v55, %v1464_v59  ;;  %v587_v47 = vadd.f32 %v586_v23, %v1479_v53  ;;  %v505_v17 = vsel %vm473_vm15, %v1447_v37, 0.0  ;;  %vm474_vm0 = vcmp.eq.s32.totalorder %v1330_v15, %v442_v9 }
  0xe8   : > { %535 = vadd.xlane.f32.xlu0 %v534_v18  ;;  %v365_v22 = vadd.f32 %v910_v60, %v908_v24  ;;  %v543_v11 = vadd.f32 %v542_v25, %v505_v17  ;;  %v580_v43 = vadd.f32 %v1368_v4, %v1359_v62  ;;  %v506_v31 = vsel %vm474_vm0, %v1464_v59, 0.0 }
  0xe9   : > { %525 = vadd.xlane.f32.xlu2 %v524_v63  ;;  %v912_v30 = vpop.eup %911  ;;  %v1597_v10 = vshrl.u32 %v406_v21, 7  ;;  %v1599_v19 = vstv %s790_s19  ;;  %vm671_vm2 = vcmask 7168   ;;  %vm698_vm10 = vcmask 0  }
  0xea   : > { %v357_v42 = vadd.f32 %v912_v30, %v356_v58  ;;  %v914_v3 = vpop.eup %913  ;;  %v544_v53 = vadd.f32 %v543_v11, %v506_v31  ;;  %v581_v2 = vadd.f32 %v580_v43, %v1402_v27 }
  0xeb   : > { %388 = vadd.xlane.f32.xlu1 %v387_v5  ;;  %v366_v36 = vadd.f32 %v914_v3, %v365_v22  ;;  %v646_v16 = vadd.s32 %v1599_v19, %v1597_v10  ;;  %v641_v21 = vadd.s32 32, %v1597_v10  ;;  %v638_v9 = vadd.s32 8, %v1597_v10 }
  0xec   : > { %v916_v38 = vpop.eup %915  ;;  %v582_v54 = vadd.f32 %v581_v2, %v1426_v44  ;;  %v639_v60 = vadd.s32 16, %v1597_v10  ;;  %v640_v55 = vadd.s32 24, %v1597_v10 }
  0xed   : > { %v367_v49 = vadd.f32 %v916_v38, %v366_v36  ;;  %vm654_vm1 = vcmp.lt.s32.totalorder %v646_v16, 256  ;;  %v647_v22 = vadd.s32 %v1599_v19, %v638_v9 }
  0xee   : > { %v648_v11 = vadd.s32 %v1599_v19, %v639_v60 }
  0xef   : > { %vm655_vm3 = vcmp.lt.s32.totalorder %v647_v22, 256 }
  0xf0   : > { %593 = vadd.xlane.f32.xlu0 %v592_v34  ;;  %vm656_vm5 = vcmp.lt.s32.totalorder %v648_v11, 256 }
  0xf1   : > { %358 = vadd.xlane.f32.xlu2 %v357_v42  ;;  %v650_v42 = vadd.s32 %v1599_v19, %v641_v21  ;;  %v644_v21 = vadd.s32 56, %v1597_v10 }
  0xf3   : > { %588 = vadd.xlane.f32.xlu1 %v587_v47  ;;  %vm658_vm4 = vcmp.lt.s32.totalorder %v650_v42, 256 }
  0xf9   : > { %368 = vadd.xlane.f32.xlu2 %v367_v49  ;;  %v649_v49 = vadd.s32 %v1599_v19, %v640_v55 }
  0xfb   : > { %545 = vadd.xlane.f32.xlu1 %v544_v53  ;;  %vm657_vm6 = vcmp.lt.s32.totalorder %v649_v49, 256 }
 0x101   : > { %583 = vadd.xlane.f32.xlu2 %v582_v54 }
 0x109   : > { %540 = vadd.xlane.f32.xlu2 %v539_v32 }
 0x12a   : > { %v559_v37 = vpop.xlane.xlu1 %558 }
 0x12b   : > { %v569_v40 = vpop.xlane.xlu0 %568  ;;  %v595_v14 = vmul.f32 0.001953125, %v559_v37 }
 0x12c   : > { %v597_v63 = vmul.f32 0.001953125, %v569_v40 }
 0x131   : > { %v564_v39 = vpop.xlane.xlu2 %563 }
 0x132   : > { %v596_v23 = vmul.f32 0.001953125, %v564_v39 }
 0x133   : > { %v1589_v13 = vpop.xlane.xlu0 %573 }
 0x134   : > { %v598_v40 = vmul.f32 0.001953125, %v1589_v13 }
 0x137   : > { %v511_v15 = vpop.xlane.xlu1 %510 }
 0x13b   : > { %v579_v1 = vpop.xlane.xlu0 %578 }
 0x13c   : > { %v599_v7 = vmul.f32 0.001953125, %v579_v1  ;;  %v642_v1 = vadd.s32 40, %v1597_v10 }
 0x143   : > { %v354_v4 = vpop.xlane.xlu0 %353 }
 0x144   : > { %917 = vlog2.f32 %v354_v4 }
 0x146   : > { %v531_v62 = vpop.xlane.xlu1 %530 }
 0x14a   : > { %v918_v44 = vpop.eup %917 }
 0x14b   : > { %v374_v26 = vpop.xlane.xlu0 %373  ;;  %v391_v28 = vmul.f32 0.6931472, %v918_v44  ;;  %v643_v44 = vadd.s32 48, %v1597_v10  ;;  %v653_v10 = vadd.s32 %v1599_v19, %v644_v21 }
 0x14c   : > { %v1591_v59 = vpop.xlane.xlu2 %515 }
 0x14d   : > { %v547_v8 = vsub.f32 %v391_v28, %v511_v15  ;;  %v603_v46 = vsub.f32 %v391_v28, %v595_v14  ;;  %v652_v55 = vadd.s32 %v1599_v19, %v643_v44  ;;  %vm661_vm9 = vcmp.lt.s32.totalorder %v653_v10, 256 }
 0x14e   : > { %v364_v48 = vpop.xlane.xlu1 %363 }
 0x14f   : > { %919 = vlog2.f32 %v364_v48  ;;  %v611_v18 = vmul.f32 0.9, %v547_v8  ;;  %v619_v52 = vmul.f32 0.1, %v603_v46  ;;  %vm660_vm8 = vcmp.lt.s32.totalorder %v652_v55, 256 }
 0x150   : > { %921 = vlog2.f32 %v374_v26 }
 0x151   : > { %v627_v24 = vadd.f32 %v619_v52, %v611_v18 }
 0x153   : > { %v379_v29 = vpop.xlane.xlu0 %378  ;;  %v662_v38 = vsel %vm654_vm1, %v627_v24, 0.0 }
 0x154   : > { %v521_v6 = vpop.xlane.xlu2 %520 }
 0x155   : > { %v920_v33 = vpop.eup %919 }
 0x156   : > { %v384_v27 = vpop.xlane.xlu1 %383  ;;  %v922_v12 = vpop.eup %921  ;;  %v395_v35 = vmul.f32 0.6931472, %v920_v33 }
 0x157   : > { %v399_v32 = vmul.f32 0.6931472, %v922_v12  ;;  %v651_v12 = vadd.s32 %v1599_v19, %v642_v1 }
 0x158   : > { %v605_v5 = vsub.f32 %v395_v35, %v597_v63  ;;  %v549_v56 = vsub.f32 %v395_v35, %v521_v6 }
 0x159   : > { %v551_v58 = vsub.f32 %v399_v32, %v531_v62  ;;  %v607_v30 = vsub.f32 %v399_v32, %v599_v7  ;;  %v672_v62 = vsel %vm671_vm2, %v662_v38, 0.0  ;;  %vm659_vm7 = vcmp.lt.s32.totalorder %v651_v12, 256 }
 0x15a   : > { %v621_v34 = vmul.f32 0.1, %v605_v5  ;;  %v613_v47 = vmul.f32 0.9, %v549_v56 }
 0x15b   : > { %v1604_v50 = vpop.xlane.xlu0 %535  ;;  %v615_v17 = vmul.f32 0.9, %v551_v58  ;;  %v623_v43 = vmul.f32 0.1, %v607_v30 }
 0x15c   : > { %v1593_v57 = vpop.xlane.xlu2 %525  ;;  %v629_v37 = vadd.f32 %v621_v34, %v613_v47 }
 0x15e   : > { %v389_v61 = vpop.xlane.xlu1 %388  ;;  %v664_v33 = vsel %vm656_vm5, %v629_v37, 0.0 }
 0x163   : > { %v594_v4 = vpop.xlane.xlu0 %593 }
 0x164   : > { %v359_v51 = vpop.xlane.xlu2 %358 }
 0x165   : > { %923 = vlog2.f32 %v359_v51  ;;  %v602_v51 = vmul.f32 0.001953125, %v594_v4 }
 0x166   : > { %925 = vlog2.f32 %v379_v29  ;;  %v589_v41 = vpop.xlane.xlu1 %588 }
 0x167   : > { %927 = vlog2.f32 %v389_v61  ;;  %v601_v16 = vmul.f32 0.001953125, %v589_v41 }
 0x16b   : > { %v924_v45 = vpop.eup %923 }
 0x16c   : > { %v393_v20 = vmul.f32 0.6931472, %v924_v45  ;;  %v369_v0 = vpop.xlane.xlu2 %368  ;;  %v926_v3 = vpop.eup %925 }
 0x16d   : > { %929 = vlog2.f32 %v369_v0  ;;  %v401_v2 = vmul.f32 0.6931472, %v926_v3  ;;  %v928_v54 = vpop.eup %927 }
 0x16e   : > { %v548_v25 = vsub.f32 %v393_v20, %v1591_v59  ;;  %v604_v36 = vsub.f32 %v393_v20, %v596_v23  ;;  %931 = vlog2.f32 %v384_v27  ;;  %v631_v59 = vadd.f32 %v623_v43, %v615_v17  ;;  %v546_v26 = vpop.xlane.xlu1 %545 }
 0x16f   : > { %v552_v13 = vsub.f32 %v401_v2, %v1604_v50  ;;  %v405_v28 = vmul.f32 0.6931472, %v928_v54 }
 0x170   : > { %v612_v31 = vmul.f32 0.9, %v548_v25  ;;  %v620_v53 = vmul.f32 0.1, %v604_v36  ;;  %v666_v56 = vsel %vm658_vm4, %v631_v59, 0.0 }
 0x171   : > { %v554_v35 = vsub.f32 %v405_v28, %v546_v26  ;;  %v616_v9 = vmul.f32 0.9, %v552_v13  ;;  %v610_v7 = vsub.f32 %v405_v28, %v602_v51  ;;  %v679_v36 = vsel %vm671_vm2, %v666_v56, 0.0  ;;  %v670_v59 = vld [vmem:[#allocation2] sm:$0x1] }
 0x172   : > { %v628_v15 = vadd.f32 %v620_v53, %v612_v31 }
 0x173   : > { %v930_v39 = vpop.eup %929  ;;  %v618_v58 = vmul.f32 0.9, %v554_v35  ;;  %v626_v20 = vmul.f32 0.1, %v610_v7 }
 0x174   : > { %v663_v48 = vsel %vm655_vm3, %v628_v15, 0.0  ;;  %v397_v6 = vmul.f32 0.6931472, %v930_v39  ;;  %v584_v27 = vpop.xlane.xlu2 %583  ;;  %v932_v14 = vpop.eup %931 }
 0x175   : > { %v673_v29 = vsel %vm671_vm2, %v663_v48, 0.0  ;;  %v600_v61 = vmul.f32 0.001953125, %v584_v27  ;;  %v403_v50 = vmul.f32 0.6931472, %v932_v14  ;;  %v634_v47 = vadd.f32 %v626_v20, %v618_v58 }
 0x176   : > { %v550_v8 = vsub.f32 %v397_v6, %v1593_v57  ;;  %v606_v46 = vsub.f32 %v397_v6, %v598_v40  ;;  %v674_v52 = vadd.f32 %v673_v29, %v672_v62  ;;  %v675_v57 = vsel %vm671_vm2, %v664_v33, 0.0 }
 0x177   : > { %v608_v18 = vsub.f32 %v401_v2, %v600_v61  ;;  %v609_v24 = vsub.f32 %v403_v50, %v601_v16  ;;  %v669_v43 = vsel %vm661_vm9, %v634_v47, 0.0 }
 0x178   : > { %v614_v32 = vmul.f32 0.9, %v550_v8  ;;  %v622_v63 = vmul.f32 0.1, %v606_v46  ;;  %v676_v30 = vadd.f32 %v675_v57, %v674_v52  ;;  %v685_v2 = vsel %vm671_vm2, %v669_v43, 0.0 }
 0x179   : > { %v624_v5 = vmul.f32 0.1, %v608_v18  ;;  %v625_v34 = vmul.f32 0.1, %v609_v24 }
 0x17a   : > { %v630_v45 = vadd.f32 %v622_v63, %v614_v32 }
 0x17b   : > { %v632_v41 = vadd.f32 %v624_v5, %v616_v9 }
 0x17c   : > { %v665_v60 = vsel %vm657_vm6, %v630_v45, 0.0  ;;  %v541_v23 = vpop.xlane.xlu2 %540 }
 0x17d   : > { %v677_v0 = vsel %vm671_vm2, %v665_v60, 0.0  ;;  %v553_v42 = vsub.f32 %v403_v50, %v541_v23  ;;  %v667_v22 = vsel %vm659_vm7, %v632_v41, 0.0 }
 0x17e   : > { %v678_v3 = vadd.f32 %v677_v0, %v676_v30  ;;  %v681_v11 = vsel %vm671_vm2, %v667_v22, 0.0 }
 0x17f   : > { %v617_v25 = vmul.f32 0.9, %v553_v42 }
 0x180   : > { %v680_v38 = vadd.f32 %v679_v36, %v678_v3 }
 0x181   : > { %v633_v17 = vadd.f32 %v625_v34, %v617_v25 }
 0x182   : > { %v682_v49 = vadd.f32 %v681_v11, %v680_v38 }
 0x183   : > { %v668_v19 = vsel %vm660_vm8, %v633_v17, 0.0 }
 0x184   : > { %v683_v31 = vsel %vm671_vm2, %v668_v19, 0.0 }
 0x185   : > { %v684_v53 = vadd.f32 %v683_v31, %v682_v49 }
 0x187   : > { %v686_v54 = vadd.f32 %v685_v2, %v684_v53 }
 0x189   : > { %687 = vadd.xlane.f32.xlu2 %v686_v54 }
 0x1fc   : > { %v688_v40 = vpop.xlane.xlu2 %687 }
 0x1fd   : > { %v689_v37 = vrot.slane %v688_v40, 4 }
 0x1ff   : > { %v690_v15 = vadd.f32 %v689_v37, %v688_v40 }
 0x201   : > { %v691_v1 = vrot.slane %v690_v15, 2 }
 0x203   : > { %v692_v39 = vadd.f32 %v691_v1, %v690_v15 }
 0x205   : > { %v693_v62 = vrot.slane %v692_v39, 1 }
 0x207   : > { %v694_v4 = vadd.f32 %v693_v62, %v692_v39 }
 0x209   : > { %798 = vpush %v694_v4 }
 0x23a   : > { %s799_s27 = spop %798  ;;  %703 = sbr.rel (%p791_p7) target bundleno = 585 (0x249), region = 40 }
 0x23b   : > { %v696_v48 = vstv %s799_s27 }
 0x23c   : > { %v697_v6 = vadd.f32 %v696_v48, %v670_v59 }
 0x23e   : > { %699 = vst.msk [vmem:[#allocation2] sm:$0x1] %vm698_vm10, %v697_v6 }
 0x245   : > { %v704_v26 = vld [vmem:[#allocation2] sm:$0x1] }
 0x246   : > { %v705_v27 = vmul.f32 0.00390625, %v704_v26 }
 0x248   : > { %706 = vst.msk [vmem:[#allocation6] sm:$0x1] %vm698_vm10, %v705_v27 }
 0x249 PF: > { %p811_p9 = scmp.eq.s32.totalorder %s1070_s13, 3  ;;  %s1035_s28 = smov [#allocation6]  }
 0x24a   : > { %s713_s29 = sshll.u32 %s1035_s28, 4  ;;  %s715_s4 = sshll.u32 %s1654_s2, 4  ;;  %s714_s29 = int_to_ptr.vmem [resolvable:$true] %s713_s29  ;;  %s716_s4 = int_to_ptr.hbm [resolvable:$true] %s715_s4 }
 0x24b   : > { %803 = dma.vmem_to_hbm [thread:$0]  (%p811_p9), %s714_s29, 16, %s716_s4, [#allocation5]  }
 0x24c   : > { %1012 = dma.done.wait (%p811_p9), [#allocation5], 16  }
 0x24d   : > { %1014 = vsyncadd (%p811_p9), [#allocation5], 4294967280 }
 0x24e PF: > { %p13_p10 = scmp.ge.s32.totalorder %s1073_s14, 6   ;;  %s1658_s9 = smov %s1021_s10 }
 0x24f   : > { %s1659_s10 = smov %s1025_s11  ;;  %s1660_s11 = smov %s1083_s17 }
 0x250   : > { %s1661_s12 = smov %s1073_s14  ;;  %15 = sbr.rel (!%p13_p10) target bundleno = 4 (0x4), region = 76 }
 0x255   :  { %729 = vsyncpa [#allocation4], 1 }
 0x256   :  { %731 = vsyncpa [#allocation4 + $0x1], 1 }
 0x257   :  { %732 = vsyncpa [#allocation5], 1 }
 0x258   :  { %734 = vsyncpa [#allocation5 + $0x1], 1 }

</bundles_post_ra>
